<compile_context>
chip_gen: v5e
topology: v5e:2x2
jax: 0.10.0
libtpu: 0.0.40
codegen_flags: <defaults>
</compile_context>

<pallas_src>
import math
from functools import partial

import jax
import jax.numpy as jnp
from jax.experimental import pallas as pl
from jax.experimental.pallas import tpu as pltpu


# ------------------------------ fused kernel ------------------------------- #
def _mha_kernel(q_ref, k_ref, v_ref,
                wq_ref, wk_ref, wv_ref, wo_ref,
                bq_ref, bk_ref, bv_ref, bo_ref,
                out_ref, attn_ref, *, inv_scale):
    # One (batch, head) pair per grid step.
    # q_ref: (Sq, H); k_ref/v_ref: (Sk, H); out_ref: (Sq, H); attn_ref: (Sq, Sk).
    xq = q_ref[...]
    xk = k_ref[...]
    xv = v_ref[...]

    # Row-wise linear projections.  Scale folded into q (bias scales too,
    # which is exact since energy is linear in q).  Weights/biases are read
    # straight from their VMEM-resident refs inside the dots.
    q = (jnp.dot(xq, wq_ref[...], preferred_element_type=jnp.float32)
         + bq_ref[...]) * inv_scale
    k = jnp.dot(xk, wk_ref[...], preferred_element_type=jnp.float32) + bk_ref[...]
    v = jnp.dot(xv, wv_ref[...], preferred_element_type=jnp.float32) + bv_ref[...]

    # energy = q @ k^T without materialising a transpose of k.
    energy = jax.lax.dot_general(
        q, k, (((1,), (1,)), ((), ())),
        preferred_element_type=jnp.float32)                 # (Sq, Sk)

    # Numerically stable softmax; reciprocal on EUP + one Newton step.
    e_max = jnp.max(energy, axis=-1, keepdims=True)
    e = jnp.exp(energy - e_max)
    s = jnp.sum(e, axis=-1, keepdims=True)                  # (Sq, 1)
    inv = pl.reciprocal(s, approx=True)
    inv = inv * (2.0 - s * inv)                             # refine to ~f32 accuracy
    attn = e * inv                                          # (Sq, Sk)

    attn_ref[...] = attn.astype(attn_ref.dtype)             # contiguous slab store

    # Context + output projection (fc_o is row-wise, so it commutes with the
    # head merge done by the wrapper).
    x = jnp.dot(attn.astype(v.dtype), v, preferred_element_type=jnp.float32)
    o = jnp.dot(x, wo_ref[...], preferred_element_type=jnp.float32) + bo_ref[...]
    out_ref[...] = o.astype(out_ref.dtype)                  # contiguous slab store


# ------------------------------ full forward ------------------------------- #
def mha_forward(query, key_in, value, params, *, n_heads):
    B, Lq, H = query.shape
    Lk = key_in.shape[1]
    assert Lq % n_heads == 0 and Lk % n_heads == 0
    Sq, Sk = Lq // n_heads, Lk // n_heads

    # Free reshape + one XLA transpose to head-major layout so each kernel
    # tile is a contiguous, lane-dense (S, H) slab (no strided gathers or
    # cross-sublane head slicing inside the kernel).
    qh = query.reshape(B, Sq, n_heads, H).transpose(0, 2, 1, 3)   # [B, nH, Sq, H]
    kh = key_in.reshape(B, Sk, n_heads, H).transpose(0, 2, 1, 3)  # [B, nH, Sk, H]
    vh = value.reshape(B, Sk, n_heads, H).transpose(0, 2, 1, 3)   # [B, nH, Sk, H]

    inv_scale = 1.0 / math.sqrt(float(H))  # scale = sqrt(head_dim) = sqrt(H)
    kernel = partial(_mha_kernel, inv_scale=inv_scale)

    w_spec = pl.BlockSpec((H, H), lambda b, h: (0, 0))       # resident weights
    b_spec = pl.BlockSpec((1, H), lambda b, h: (0, 0))       # resident biases
    q_spec = pl.BlockSpec((None, None, Sq, H), lambda b, h: (b, h, 0, 0))
    kv_spec = pl.BlockSpec((None, None, Sk, H), lambda b, h: (b, h, 0, 0))

    out_hm, attn = pl.pallas_call(
        kernel,
        out_shape=(
            jax.ShapeDtypeStruct((B, n_heads, Sq, H), query.dtype),
            jax.ShapeDtypeStruct((B, n_heads, Sq, Sk), jnp.float32),
        ),
        grid=(B, n_heads),
        in_specs=[
            q_spec, kv_spec, kv_spec,
            w_spec, w_spec, w_spec, w_spec,
            b_spec, b_spec, b_spec, b_spec,
        ],
        out_specs=(
            pl.BlockSpec((None, None, Sq, H), lambda b, h: (b, h, 0, 0)),
            pl.BlockSpec((None, None, Sq, Sk), lambda b, h: (b, h, 0, 0)),
        ),
        compiler_params=pltpu.CompilerParams(
            dimension_semantics=("parallel", "parallel"),
            vmem_limit_bytes=64 << 20,
        ),
    )(qh, kh, vh,
      params["wq"], params["wk"], params["wv"], params["wo"],
      params["bq"].reshape(1, H), params["bk"].reshape(1, H),
      params["bv"].reshape(1, H), params["bo"].reshape(1, H))

    # Merge heads back: [B, nH, Sq, H] -> [B, Sq, nH, H] -> [B, Lq, H]
    out = out_hm.transpose(0, 2, 1, 3).reshape(B, Lq, H)
    return out, attn


# ------------------------------- reference --------------------------------- #
def ref_forward(query, key_in, value, params, *, n_heads):
    B, Lq, H = query.shape
    Q = query @ params["wq"] + params["bq"]
    K = key_in @ params["wk"] + params["bk"]
    V = value @ params["wv"] + params["bv"]
    Qh = Q.reshape(B, -1, n_heads, H).transpose(0, 2, 1, 3)
    Kh = K.reshape(B, -1, n_heads, H).transpose(0, 2, 1, 3)
    Vh = V.reshape(B, -1, n_heads, H).transpose(0, 2, 1, 3)
    energy = jnp.einsum("bhqd,bhkd->bhqk", Qh, Kh) / math.sqrt(float(H))
    attn = jax.nn.softmax(energy, axis=-1)
    x = jnp.einsum("bhqk,bhkd->bhqd", attn, Vh)
    x = x.transpose(0, 2, 1, 3).reshape(B, -1, H)
    out = x @ params["wo"] + params["bo"]
    return out, attn


# ---------------------------------- main ------------------------------------ #
if __name__ == "__main__":
    B, L, H, n_heads = 2, 8, 32, 2  # L divisible by n_heads

    root = jax.random.PRNGKey(0)
    ks = jax.random.split(root, 11)

    def lin_init(kw, kb, fan_in, fan_out):
        bound = 1.0 / math.sqrt(fan_in)
        w = jax.random.uniform(kw, (fan_in, fan_out), jnp.float32, -bound, bound)
        b = jax.random.uniform(kb, (fan_out,), jnp.float32, -bound, bound)
        return w, b

    wq, bq = lin_init(ks[0], ks[1], H, H)
    wk, bk = lin_init(ks[2], ks[3], H, H)
    wv, bv = lin_init(ks[4], ks[5], H, H)
    wo, bo = lin_init(ks[6], ks[7], H, H)
    params = dict(wq=wq, bq=bq, wk=wk, bk=bk, wv=wv, bv=bv, wo=wo, bo=bo)

    query = jax.random.normal(ks[8], (B, L, H), jnp.float32)
    key_in = jax.random.normal(ks[9], (B, L, H), jnp.float32)
    value = jax.random.normal(ks[10], (B, L, H), jnp.float32)

    fwd = jax.jit(partial(mha_forward, n_heads=n_heads))
    out, attn = fwd(query, key_in, value, params)
    jax.block_until_ready((out, attn))

    out_ref, attn_ref = ref_forward(query, key_in, value, params, n_heads=n_heads)
    assert out.shape == (B, L, H)
    assert attn.shape == (B, n_heads, L // n_heads, L // n_heads)
    assert jnp.allclose(out, out_ref, atol=1e-4, rtol=1e-4)
    assert jnp.allclose(attn, attn_ref, atol=1e-4, rtol=1e-4)

    print("KERNEL_OK")
</pallas_src>

<mosaic_0001>
module attributes {stable_mosaic.version = 11 : i64} {
  func.func @_mha_kernel(%arg0: i32, %arg1: i32, %arg2: memref<1x1x4x32xf32, #tpu.memory_space<vmem>>, %arg3: memref<1x1x4x32xf32, #tpu.memory_space<vmem>>, %arg4: memref<1x1x4x32xf32, #tpu.memory_space<vmem>>, %arg5: memref<32x32xf32, #tpu.memory_space<vmem>>, %arg6: memref<32x32xf32, #tpu.memory_space<vmem>>, %arg7: memref<32x32xf32, #tpu.memory_space<vmem>>, %arg8: memref<32x32xf32, #tpu.memory_space<vmem>>, %arg9: memref<1x32xf32, #tpu.memory_space<vmem>>, %arg10: memref<1x32xf32, #tpu.memory_space<vmem>>, %arg11: memref<1x32xf32, #tpu.memory_space<vmem>>, %arg12: memref<1x32xf32, #tpu.memory_space<vmem>>, %arg13: memref<1x1x4x32xf32, #tpu.memory_space<vmem>>, %arg14: memref<1x1x4x4xf32, #tpu.memory_space<vmem>>) attributes {dimension_semantics = [#tpu.dimension_semantics<parallel>, #tpu.dimension_semantics<parallel>], iteration_bounds = array<i64: 2, 2>, scalar_prefetch = 0 : i64, scratch_operands = 0 : i64, tpu.core_type = #tpu.core_type<tc>, window_params = [{transform_indices = @transform_0, window_bounds = array<i64: 1, 1, 4, 32>}, {transform_indices = @transform_1, window_bounds = array<i64: 1, 1, 4, 32>}, {transform_indices = @transform_2, window_bounds = array<i64: 1, 1, 4, 32>}, {pipeline_mode = #tpu.pipeline_mode<synchronous>, transform_indices = @transform_3, window_bounds = array<i64: 32, 32>}, {pipeline_mode = #tpu.pipeline_mode<synchronous>, transform_indices = @transform_4, window_bounds = array<i64: 32, 32>}, {pipeline_mode = #tpu.pipeline_mode<synchronous>, transform_indices = @transform_5, window_bounds = array<i64: 32, 32>}, {pipeline_mode = #tpu.pipeline_mode<synchronous>, transform_indices = @transform_6, window_bounds = array<i64: 32, 32>}, {pipeline_mode = #tpu.pipeline_mode<synchronous>, transform_indices = @transform_7, window_bounds = array<i64: 1, 32>}, {pipeline_mode = #tpu.pipeline_mode<synchronous>, transform_indices = @transform_8, window_bounds = array<i64: 1, 32>}, {pipeline_mode = #tpu.pipeline_mode<synchronous>, transform_indices = @transform_9, window_bounds = array<i64: 1, 32>}, {pipeline_mode = #tpu.pipeline_mode<synchronous>, transform_indices = @transform_10, window_bounds = array<i64: 1, 32>}, {transform_indices = @transform_11, window_bounds = array<i64: 1, 1, 4, 32>}, {transform_indices = @transform_12, window_bounds = array<i64: 1, 1, 4, 4>}]} {
    %c0 = arith.constant 0 : index
    %c0_0 = arith.constant 0 : index
    %c0_1 = arith.constant 0 : index
    %c0_2 = arith.constant 0 : index
    %0 = vector.load %arg2[%c0, %c0_0, %c0_1, %c0_2] : memref<1x1x4x32xf32, #tpu.memory_space<vmem>>, vector<1x1x4x32xf32>
    %1 = vector.shape_cast %0 : vector<1x1x4x32xf32> to vector<4x32xf32>
    %c0_3 = arith.constant 0 : index
    %c0_4 = arith.constant 0 : index
    %c0_5 = arith.constant 0 : index
    %c0_6 = arith.constant 0 : index
    %2 = vector.load %arg3[%c0_3, %c0_4, %c0_5, %c0_6] : memref<1x1x4x32xf32, #tpu.memory_space<vmem>>, vector<1x1x4x32xf32>
    %3 = vector.shape_cast %2 : vector<1x1x4x32xf32> to vector<4x32xf32>
    %c0_7 = arith.constant 0 : index
    %c0_8 = arith.constant 0 : index
    %c0_9 = arith.constant 0 : index
    %c0_10 = arith.constant 0 : index
    %4 = vector.load %arg4[%c0_7, %c0_8, %c0_9, %c0_10] : memref<1x1x4x32xf32, #tpu.memory_space<vmem>>, vector<1x1x4x32xf32>
    %5 = vector.shape_cast %4 : vector<1x1x4x32xf32> to vector<4x32xf32>
    %c0_11 = arith.constant 0 : index
    %c0_12 = arith.constant 0 : index
    %6 = vector.load %arg5[%c0_11, %c0_12] : memref<32x32xf32, #tpu.memory_space<vmem>>, vector<32x32xf32>
    %cst = arith.constant dense<0.000000e+00> : vector<4x32xf32>
    %7 = tpu.matmul %1, %6, %cst {dimension_numbers = #tpu.dot_dimension_numbers<[1], [0], [0], [1], [0, 0, 1, 1], [], []>} : vector<4x32xf32>, vector<32x32xf32>, vector<4x32xf32> -> vector<4x32xf32>
    %c0_13 = arith.constant 0 : index
    %c0_14 = arith.constant 0 : index
    %8 = vector.load %arg9[%c0_13, %c0_14] : memref<1x32xf32, #tpu.memory_space<vmem>>, vector<1x32xf32>
    %9 = vector.broadcast %8 : vector<1x32xf32> to vector<4x32xf32>
    %10 = arith.addf %7, %9 : vector<4x32xf32>
    %cst_15 = arith.constant 0.176776692 : f32
    %11 = vector.broadcast %cst_15 : f32 to vector<4x32xf32>
    %12 = arith.mulf %10, %11 : vector<4x32xf32>
    %c0_16 = arith.constant 0 : index
    %c0_17 = arith.constant 0 : index
    %13 = vector.load %arg6[%c0_16, %c0_17] : memref<32x32xf32, #tpu.memory_space<vmem>>, vector<32x32xf32>
    %cst_18 = arith.constant dense<0.000000e+00> : vector<4x32xf32>
    %14 = tpu.matmul %3, %13, %cst_18 {dimension_numbers = #tpu.dot_dimension_numbers<[1], [0], [0], [1], [0, 0, 1, 1], [], []>} : vector<4x32xf32>, vector<32x32xf32>, vector<4x32xf32> -> vector<4x32xf32>
    %c0_19 = arith.constant 0 : index
    %c0_20 = arith.constant 0 : index
    %15 = vector.load %arg10[%c0_19, %c0_20] : memref<1x32xf32, #tpu.memory_space<vmem>>, vector<1x32xf32>
    %16 = vector.broadcast %15 : vector<1x32xf32> to vector<4x32xf32>
    %17 = arith.addf %14, %16 : vector<4x32xf32>
    %c0_21 = arith.constant 0 : index
    %c0_22 = arith.constant 0 : index
    %18 = vector.load %arg7[%c0_21, %c0_22] : memref<32x32xf32, #tpu.memory_space<vmem>>, vector<32x32xf32>
    %cst_23 = arith.constant dense<0.000000e+00> : vector<4x32xf32>
    %19 = tpu.matmul %5, %18, %cst_23 {dimension_numbers = #tpu.dot_dimension_numbers<[1], [0], [0], [1], [0, 0, 1, 1], [], []>} : vector<4x32xf32>, vector<32x32xf32>, vector<4x32xf32> -> vector<4x32xf32>
    %c0_24 = arith.constant 0 : index
    %c0_25 = arith.constant 0 : index
    %20 = vector.load %arg11[%c0_24, %c0_25] : memref<1x32xf32, #tpu.memory_space<vmem>>, vector<1x32xf32>
    %21 = vector.broadcast %20 : vector<1x32xf32> to vector<4x32xf32>
    %22 = arith.addf %19, %21 : vector<4x32xf32>
    %cst_26 = arith.constant dense<0.000000e+00> : vector<4x4xf32>
    %23 = tpu.matmul %12, %17, %cst_26 {dimension_numbers = #tpu.dot_dimension_numbers<[1], [1], [0], [0], [0, 0, 1, 0], [], []>} : vector<4x32xf32>, vector<4x32xf32>, vector<4x4xf32> -> vector<4x4xf32>
    %cst_27 = arith.constant dense<0xFF800000> : vector<4xf32>
    %24 = vector.multi_reduction <maximumf>, %23, %cst_27 [1] : vector<4x4xf32> to vector<4xf32>
    %25 = vector.shape_cast %24 : vector<4xf32> to vector<4x1xf32>
    %26 = vector.broadcast %25 : vector<4x1xf32> to vector<4x4xf32>
    %27 = arith.subf %23, %26 : vector<4x4xf32>
    %28 = math.exp %27 : vector<4x4xf32>
    %cst_28 = arith.constant dense<0.000000e+00> : vector<4xf32>
    %29 = vector.multi_reduction <add>, %28, %cst_28 [1] : vector<4x4xf32> to vector<4xf32>
    %30 = vector.shape_cast %29 : vector<4xf32> to vector<4x1xf32>
    %31 = tpu.reciprocal %30 {approx = true} : vector<4x1xf32> -> vector<4x1xf32>
    %32 = arith.mulf %30, %31 : vector<4x1xf32>
    %cst_29 = arith.constant 2.000000e+00 : f32
    %33 = vector.broadcast %cst_29 : f32 to vector<4x1xf32>
    %34 = arith.subf %33, %32 : vector<4x1xf32>
    %35 = arith.mulf %31, %34 : vector<4x1xf32>
    %36 = vector.broadcast %35 : vector<4x1xf32> to vector<4x4xf32>
    %37 = arith.mulf %28, %36 : vector<4x4xf32>
    %c0_30 = arith.constant 0 : index
    %c0_31 = arith.constant 0 : index
    %c0_32 = arith.constant 0 : index
    %c0_33 = arith.constant 0 : index
    %38 = vector.load %arg14[%c0_30, %c0_31, %c0_32, %c0_33] : memref<1x1x4x4xf32, #tpu.memory_space<vmem>>, vector<1x1x4x4xf32>
    %39 = vector.shape_cast %38 : vector<1x1x4x4xf32> to vector<4x4xf32>
    %40 = vector.shape_cast %37 : vector<4x4xf32> to vector<1x1x4x4xf32>
    tpu.vector_store %arg14[%c0_30, %c0_31, %c0_32, %c0_33], %40 {strides = array<i32>} : memref<1x1x4x4xf32, #tpu.memory_space<vmem>>, vector<1x1x4x4xf32>,
    %cst_34 = arith.constant dense<0.000000e+00> : vector<4x32xf32>
    %41 = tpu.matmul %37, %22, %cst_34 {dimension_numbers = #tpu.dot_dimension_numbers<[1], [0], [0], [1], [0, 0, 1, 1], [], []>} : vector<4x4xf32>, vector<4x32xf32>, vector<4x32xf32> -> vector<4x32xf32>
    %c0_35 = arith.constant 0 : index
    %c0_36 = arith.constant 0 : index
    %42 = vector.load %arg8[%c0_35, %c0_36] : memref<32x32xf32, #tpu.memory_space<vmem>>, vector<32x32xf32>
    %cst_37 = arith.constant dense<0.000000e+00> : vector<4x32xf32>
    %43 = tpu.matmul %41, %42, %cst_37 {dimension_numbers = #tpu.dot_dimension_numbers<[1], [0], [0], [1], [0, 0, 1, 1], [], []>} : vector<4x32xf32>, vector<32x32xf32>, vector<4x32xf32> -> vector<4x32xf32>
    %c0_38 = arith.constant 0 : index
    %c0_39 = arith.constant 0 : index
    %44 = vector.load %arg12[%c0_38, %c0_39] : memref<1x32xf32, #tpu.memory_space<vmem>>, vector<1x32xf32>
    %45 = vector.broadcast %44 : vector<1x32xf32> to vector<4x32xf32>
    %46 = arith.addf %43, %45 : vector<4x32xf32>
    %c0_40 = arith.constant 0 : index
    %c0_41 = arith.constant 0 : index
    %c0_42 = arith.constant 0 : index
    %c0_43 = arith.constant 0 : index
    %47 = vector.load %arg13[%c0_40, %c0_41, %c0_42, %c0_43] : memref<1x1x4x32xf32, #tpu.memory_space<vmem>>, vector<1x1x4x32xf32>
    %48 = vector.shape_cast %47 : vector<1x1x4x32xf32> to vector<4x32xf32>
    %49 = vector.shape_cast %46 : vector<4x32xf32> to vector<1x1x4x32xf32>
    tpu.vector_store %arg13[%c0_40, %c0_41, %c0_42, %c0_43], %49 {strides = array<i32>} : memref<1x1x4x32xf32, #tpu.memory_space<vmem>>, vector<1x1x4x32xf32>,
    return
  }
  func.func @transform_0(%arg0: i32, %arg1: i32) -> (i32, i32, i32, i32) {
    %c0_i32 = arith.constant 0 : i32
    %c0_i32_0 = arith.constant 0 : i32
    %c0_i32_1 = arith.constant 0 : i32
    return %arg0, %arg1, %c0_i32, %c0_i32_0 : i32, i32, i32, i32
  }
  func.func @transform_1(%arg0: i32, %arg1: i32) -> (i32, i32, i32, i32) {
    %c0_i32 = arith.constant 0 : i32
    %c0_i32_0 = arith.constant 0 : i32
    %c0_i32_1 = arith.constant 0 : i32
    return %arg0, %arg1, %c0_i32, %c0_i32_0 : i32, i32, i32, i32
  }
  func.func @transform_2(%arg0: i32, %arg1: i32) -> (i32, i32, i32, i32) {
    %c0_i32 = arith.constant 0 : i32
    %c0_i32_0 = arith.constant 0 : i32
    %c0_i32_1 = arith.constant 0 : i32
    return %arg0, %arg1, %c0_i32, %c0_i32_0 : i32, i32, i32, i32
  }
  func.func @transform_3(%arg0: i32, %arg1: i32) -> (i32, i32) {
    %c0_i32 = arith.constant 0 : i32
    %c0_i32_0 = arith.constant 0 : i32
    %c0_i32_1 = arith.constant 0 : i32
    return %c0_i32, %c0_i32_0 : i32, i32
  }
  func.func @transform_4(%arg0: i32, %arg1: i32) -> (i32, i32) {
    %c0_i32 = arith.constant 0 : i32
    %c0_i32_0 = arith.constant 0 : i32
    %c0_i32_1 = arith.constant 0 : i32
    return %c0_i32, %c0_i32_0 : i32, i32
  }
  func.func @transform_5(%arg0: i32, %arg1: i32) -> (i32, i32) {
    %c0_i32 = arith.constant 0 : i32
    %c0_i32_0 = arith.constant 0 : i32
    %c0_i32_1 = arith.constant 0 : i32
    return %c0_i32, %c0_i32_0 : i32, i32
  }
  func.func @transform_6(%arg0: i32, %arg1: i32) -> (i32, i32) {
    %c0_i32 = arith.constant 0 : i32
    %c0_i32_0 = arith.constant 0 : i32
    %c0_i32_1 = arith.constant 0 : i32
    return %c0_i32, %c0_i32_0 : i32, i32
  }
  func.func @transform_7(%arg0: i32, %arg1: i32) -> (i32, i32) {
    %c0_i32 = arith.constant 0 : i32
    %c0_i32_0 = arith.constant 0 : i32
    %c0_i32_1 = arith.constant 0 : i32
    return %c0_i32, %c0_i32_0 : i32, i32
  }
  func.func @transform_8(%arg0: i32, %arg1: i32) -> (i32, i32) {
    %c0_i32 = arith.constant 0 : i32
    %c0_i32_0 = arith.constant 0 : i32
    %c0_i32_1 = arith.constant 0 : i32
    return %c0_i32, %c0_i32_0 : i32, i32
  }
  func.func @transform_9(%arg0: i32, %arg1: i32) -> (i32, i32) {
    %c0_i32 = arith.constant 0 : i32
    %c0_i32_0 = arith.constant 0 : i32
    %c0_i32_1 = arith.constant 0 : i32
    return %c0_i32, %c0_i32_0 : i32, i32
  }
  func.func @transform_10(%arg0: i32, %arg1: i32) -> (i32, i32) {
    %c0_i32 = arith.constant 0 : i32
    %c0_i32_0 = arith.constant 0 : i32
    %c0_i32_1 = arith.constant 0 : i32
    return %c0_i32, %c0_i32_0 : i32, i32
  }
  func.func @transform_11(%arg0: i32, %arg1: i32) -> (i32, i32, i32, i32) {
    %c0_i32 = arith.constant 0 : i32
    %c0_i32_0 = arith.constant 0 : i32
    %c0_i32_1 = arith.constant 0 : i32
    return %arg0, %arg1, %c0_i32, %c0_i32_0 : i32, i32, i32, i32
  }
  func.func @transform_12(%arg0: i32, %arg1: i32) -> (i32, i32, i32, i32) {
    %c0_i32 = arith.constant 0 : i32
    %c0_i32_0 = arith.constant 0 : i32
    %c0_i32_1 = arith.constant 0 : i32
    return %arg0, %arg1, %c0_i32, %c0_i32_0 : i32, i32, i32, i32
  }
}

</mosaic_0001>

<bundles_post_ra>
// kernel: mha_forward.1
= control target key start
LH: loop header
LB: loop body
LE: loop exit
PB: predicated region body
PF: predicated region fallthrough
CT: control target
= control target key end

     0   :  { %s1532_s0 = inlined_call_operand.vmem [shape: f32[2,2,4,32], index: 0, kind: input, shape index: {}]   ;;  %s1533_s1 = inlined_call_operand.vmem [shape: f32[2,2,4,32], index: 1, kind: input, shape index: {}]   ;;  %s1534_s2 = inlined_call_operand.vmem [shape: f32[2,2,4,32], index: 2, kind: input, shape index: {}]   ;;  %s1535_s3 = inlined_call_operand.vmem [shape: f32[32,32], index: 3, kind: input, shape index: {}]   ;;  %s1536_s4 = inlined_call_operand.vmem [shape: f32[32,32], index: 4, kind: input, shape index: {}]   ;;  %s1537_s5 = inlined_call_operand.hbm [shape: f32[32,32], index: 5, kind: input, shape index: {}]   ;;  %s1538_s6 = inlined_call_operand.hbm [shape: f32[32,32], index: 6, kind: input, shape index: {}]   ;;  %s1539_s7 = inlined_call_operand.vmem [shape: f32[1,32], index: 7, kind: input, shape index: {}]   ;;  %s1540_s8 = inlined_call_operand.vmem [shape: f32[1,32], index: 8, kind: input, shape index: {}]   ;;  %s1541_s9 = inlined_call_operand.vmem [shape: f32[1,32], index: 9, kind: input, shape index: {}]   ;;  %s1542_s10 = inlined_call_operand.vmem [shape: f32[1,32], index: 10, kind: input, shape index: {}]   ;;  %s1543_s11 = inlined_call_operand.vmem [shape: f32[2,2,4,32], index: 11, kind: output, shape index: {0}]   ;;  %s1544_s12 = inlined_call_operand.hbm [shape: f32[2,2,4,4], index: 12, kind: output, shape index: {1}]  }
   0x1   :  { %1554 = sst [smem:[#allocation18_spill]] %s1542_s10 }
   0x2   :  { %1555 = sst [smem:[#allocation19_spill]] %s1543_s11 }
   0x3   :  { %1556 = sst [smem:[#allocation20_spill]] %s1544_s12 }
   0x4   :  { %18 = vsyncpa [#allocation3], 0 }
   0x5   :  { %19 = vsyncpa [#allocation6], 0 }
   0x6   :  { %20 = vsyncpa [#allocation4], 0 }
   0x7   :  { %22 = vsyncpa [#allocation4 + $0x1], 0  ;;  %s1322_s21 = smov 0   ;;  %s1324_s22 = smov 0  }
   0x8   :  { %s1326_s23 = smov 0   ;;  %s1328_s24 = smov 0  }
   0x9   :  { %s1330_s25 = smov 0   ;;  %s1332_s26 = smov 0  }
   0xa   :  { %s1334_s27 = smov 0   ;;  %s1336_s28 = smov 0  }
   0xb LB: > { %1557 = sst [smem:[#allocation11_spill]] %s1223_s21  ;;  %s956_s29 = sadd.s32 4294967295, %s1251_s28   ;;  %s1251_s28 = sphi %s1336_s28, %s1581_s28   ;;  %s1247_s27 = sphi %s1334_s27, %s1577_s27   ;;  %s1243_s26 = sphi %s1332_s26, %s1576_s26   ;;  %s1239_s25 = sphi %s1330_s25, %s1575_s25   ;;  %s1235_s24 = sphi %s1328_s24, %s1574_s24   ;;  %s1231_s23 = sphi %s1326_s23, %s1580_s23   ;;  %s1227_s22 = sphi %s1324_s22, %s1579_s22   ;;  %s1223_s21 = sphi %s1322_s21, %s1578_s21  }
   0xc   : > { %1558 = sst [smem:[#allocation12_spill]] %s1243_s26  ;;  %s957_s30 = sadd.s32 4294967294, %s1251_s28  }
   0xd   : > { %1559 = sst [smem:[#allocation13_spill]] %s1247_s27  ;;  %s37_s13 = sadd.s32 1, %s1243_s26 }
   0xe   : > { %1560 = sst [smem:[#allocation14_spill]] %s1251_s28  ;;  %s40_s14 = sadd.s32 1, %s1247_s27 }
   0xf   : > { %p38_p0 = scmp.ge.s32.totalorder %s37_s13, 2  ;;  %s329_s15 = sadd.s32 1, %s1231_s23 }
  0x10   : > { %p339_p1 = scmp.ne.s32.totalorder %s1231_s23, %s1227_s22  ;;  %p340_p2 = scmp.eq.s32.totalorder %s956_s29, 3 }
  0x11   : > { %s1583_s13 = smov (%p38_p0, %s37_s13), 0  ;;  %s1585_s14 = smov (!%p38_p0, %s40_s14), %s1247_s27 }
  0x12   : > { %1561 = sst [smem:[#allocation15_spill]] %s1583_s13  ;;  %s325_s16 = ssub.s32 %s1243_s26, %s1583_s13 }
  0x13   : > { %p1374_p3 = por %p340_p2, %p339_p1  ;;  %p42_p4 = scmp.ge.s32.totalorder %s1585_s14, 2 }
  0x14   : > { %p345_p5 = scmp.ne.s32.totalorder %s1227_s22, %s1223_s21  ;;  %p346_p6 = scmp.eq.s32.totalorder %s957_s30, 3 }
  0x15   : > { %p958_p7 = scmp.ge.s32.totalorder %s1251_s28, 1  ;;  %s1587_s14 = smov (%p42_p4, %s1585_s14), 0 }
  0x16   : > { %1563 = sst [smem:[#allocation16_spill]] %s1587_s14  ;;  %p1383_p8 = por %p346_p6, %p345_p5 }
  0x17   : > { %p353_p9 = scmp.lt.s32.totalorder %s1251_s28, 5  ;;  %s324_s19 = ssub.s32 %s1247_s27, %s1587_s14 }
  0x18   : > { %s1564_s18 = scalar_select %p1383_p8, 1, 0 }
  0x19   : > { %s326_s20 = sor.u32 %s325_s16, %s324_s19  ;;  %p1390_p10 = pnand %p958_p7, %p353_p9 }
  0x1a   : > { %1565 = sst [smem:[#allocation17_spill]] %s1564_s18  ;;  %p327_p11 = scmp.eq.s32.totalorder %s326_s20, 0 }
  0x1b   : > { %p1394_p12 = scmp.eq.s32.totalorder %s956_s29, 0  ;;  %p997_p13 = pneg %p1390_p10 }
  0x1c   : > { %s370_s18 = sshll.u32 %s1537_s5, 4  ;;  %s1253_s16 = smov [#allocation2]   ;;  %s371_s18 = int_to_ptr.hbm [resolvable:$true] %s370_s18 }
  0x1d   : > { %s1404_s28 = scalar_select %p327_p11, %s1231_s23, %s329_s15  }
  0x1e   : > { %s372_s19 = sshll.u32 %s1253_s16, 4  ;;  %p998_p0 = pnand %p1394_p12, %p997_p13  ;;  %s373_s19 = int_to_ptr.vmem [resolvable:$true] %s372_s19 }
  0x1f   : > { %s1254_s20 = smov 128   ;;  %s1255_s29 = smov 8  }
  0x20   : > { %1000 = dma.hbm_to_vmem [thread:$0]  (!%p998_p0), %s371_s18, 512, %s373_s19, [#allocation3], %s1254_s20, %s1254_s20, %s1255_s29  }
  0x21   : > { %s384_s11 = sshll.u32 %s1538_s6, 4  ;;  %s1256_s10 = smov [#allocation5]   ;;  %s385_s11 = int_to_ptr.hbm [resolvable:$true] %s384_s11 }
  0x22   : > { %s386_s12 = sshll.u32 %s1256_s10, 4  ;;  %447 = sbr.rel (%p1390_p10) target bundleno = 835 (0x343), region = 64  ;;  %s387_s12 = int_to_ptr.vmem [resolvable:$true] %s386_s12 }
  0x23   : > { %1003 = dma.hbm_to_vmem [thread:$0]  (!%p998_p0), %s385_s11, 512, %s387_s12, [#allocation6], %s1254_s20, %s1254_s20, %s1255_s29  }
  0x27   : > { %1210 = dma.done.wait (%p1394_p12), [#allocation3], 512  }
  0x28   : > { %1212 = vsyncadd (%p1394_p12), [#allocation3], 4294966784 }
  0x29   : > { %1214 = dma.done.wait (%p1394_p12), [#allocation6], 512  }
  0x2a   : > { %1216 = vsyncadd (%p1394_p12), [#allocation6], 4294966784  ;;  %p522_p1 = scmp.lt.s32.totalorder %s1239_s25, 1  ;;  %p524_p2 = scmp.lt.s32.totalorder %s1235_s24, 1  ;;  %v593_v0 = vld [vmem:[%s1536_s4 + $0x18] sm:$0xff]  ;;  %v592_v2 = vld [vmem:[%s1536_s4 + $0x10] sm:$0xff] }
  0x2b   : > { %v560_v1 = vld [vmem:[%s1535_s3 + $0x18] sm:$0xff]  ;;  %613 = vmatpush.msra.mxu1 %v593_v0  ;;  %v559_v3 = vld [vmem:[%s1535_s3 + $0x10] sm:$0xff]  ;;  %v591_v4 = vld [vmem:[%s1536_s4 + $0x8] sm:$0xff]  ;;  %vm565_vm0 = vcmask 261120   ;;  %vm678_vm1 = vcmask 27648   ;;  %vm698_vm2 = vcmask 1043456  }
  0x2c   : > { %s523_s10 = scalar_select %p522_p1, %s1239_s25, 1  ;;  %581 = vmatpush.msra.mxu0 %v560_v1  ;;  %v558_v5 = vld [vmem:[%s1535_s3 + $0x8] sm:$0xff]  ;;  %v590_v6 = vld [vmem:[%s1536_s4] sm:$0xff]  ;;  %v624_v17 = vld [vmem:[#allocation2 + $0x18] sm:$0xff]  ;;  %vm694_vm3 = vcmask 31744  }
  0x2d   : > { %s525_s11 = scalar_select %p524_p2, %s1235_s24, 1  ;;  %614 = vmatpush.msra.mxu1 %v592_v2  ;;  %v557_v7 = vld [vmem:[%s1535_s3] sm:$0xff]  ;;  %v623_v18 = vld [vmem:[#allocation2 + $0x10] sm:$0xff]  ;;  %644 = vmatpush.msra.mxu2 %v624_v17  ;;  %v622_v19 = vld [vmem:[#allocation2 + $0x8] sm:$0xff] }
  0x2e   : > { %s966_s12 = sshll.u32 %s523_s10, 1  ;;  %582 = vmatpush.msra.mxu0 %v559_v3  ;;  %v1081_v10 = vld [vmem:[%s1540_s8] ss:$0 sm:$0xff]  ;;  %v725_v32 = vld [vmem:[#allocation5 + $0x18] sm:$0xff]  ;;  %v724_v33 = vld [vmem:[#allocation5 + $0x10] sm:$0xff]  ;;  %s983_s16 = sshll.u32 %s1239_s25, 1 }
  0x2f   : > { %s527_s21 = sadd.s32 %s966_s12, %s525_s11  ;;  %615 = vmatpush.msra.mxu1 %v591_v4  ;;  %v1082_v11 = vld [vmem:[%s1539_s7] ss:$0 sm:$0xff]  ;;  %645 = vmatpush.msra.mxu2 %v623_v18  ;;  %v723_v34 = vld [vmem:[#allocation5 + $0x8] sm:$0xff]  ;;  %s777_s19 = sadd.s32 %s1235_s24, %s983_s16 }
  0x30   : > { %s1425_s27 = sshll.u32 %s527_s21, 2  ;;  %583 = vmatpush.msra.mxu0 %v558_v5  ;;  %v621_v22 = vld [vmem:[#allocation2] sm:$0xff]  ;;  %s984_s20 = sshll.u32 %s777_s19, 2 }
  0x31   : > { %s537_s13 = scalar_lea.vmem %s1533_s1, %s1425_s27  ;;  %s529_s15 = scalar_lea.vmem %s1532_s0, %s1425_s27  ;;  %616 = vmatpush.msra.mxu1 %v590_v6  ;;  %646 = vmatpush.msra.mxu2 %v622_v19  ;;  %v1083_v29 = vld [vmem:[%s1541_s9] ss:$0 sm:$0xff] }
  0x32   : > { %v555_v8 = vld [vmem:[%s537_s13] sm:$0xf]  ;;  %584 = vmatpush.msra.mxu0 %v557_v7  ;;  %s545_s13 = scalar_lea.vmem %s1534_s2, %s1425_s27  ;;  %s1568_s11 = sld [smem:[#allocation20_spill]] }
  0x33   : > { %v554_v9 = vld [vmem:[%s529_s15] sm:$0xf]  ;;  %975 = vmatmul.msk.f32.vlgmr.msra.gmra.mxu1 %vm565_vm0, %v555_v8  ;;  %647 = vmatpush.msra.mxu2 %v621_v22  ;;  %s519_s15 = sand.u32 1, %s1227_s22  }
  0x34   : > { %974 = vmatmul.msk.f32.vlgmr.msra.gmra.mxu0 %vm565_vm0, %v554_v9  ;;  %v556_v23 = vld [vmem:[%s545_s13] sm:$0xf]  ;;  %s965_s18 = sshll.u32 %s519_s15, 2  ;;  %s764_s14 = scalar_lea.sflag [#allocation4], %s519_s15 }
  0x35   : > { %976 = vmatmul.msk.f32.vlgmr.msra.gmra.mxu2 %vm565_vm0, %v556_v23  ;;  %745 = vmatpush.msrb.mxu0 %v725_v32  ;;  %v722_v35 = vld [vmem:[#allocation5] sm:$0xff]  ;;  %s521_s30 = scalar_lea.vmem [#allocation7], %s965_s18 }
  0x36   : > { %s781_s21 = sshll.u32 %s521_s30, 4  ;;  %s782_s21 = int_to_ptr.vmem [resolvable:$true] %s781_s21 }
  0x37   : > { %746 = vmatpush.msrb.mxu0 %v724_v33 }
  0x38   : > { %s779_s12 = scalar_lea.hbm %s1568_s11, %s984_s20  ;;  %s1169_s16 = scalar_lea.hbm %s1568_s11, 16 }
  0x39   : > { %747 = vmatpush.msrb.mxu0 %v723_v34  ;;  %s783_s13 = sshll.u32 %s779_s12, 4  ;;  %s784_s13 = int_to_ptr.hbm [resolvable:$true] %s783_s13 }
  0x3a   : > { %s1163_s26 = sshra.s32 %s784_s13, 4  ;;  %s1164_s26 = int_to_ptr.hbm [resolvable:$true] %s1163_s26 }
  0x3b   : > { %748 = vmatpush.msrb.mxu0 %v722_v35  ;;  %s1165_s18 = scalar_lea.hbm %s1164_s26, 4  ;;  %p1170_p7 = scmp.lt.s32.totalorder %s1164_s26, %s1568_s11 }
  0x3c   : > { %p1166_p4 = scmp.ne.s32.totalorder %s1164_s26, %s1165_s18  ;;  %p1171_p9 = scmp.lt.s32.totalorder %s1169_s16, %s1165_s18 }
  0x3e   : > { %p1167_p5 = pnand %p1166_p4, %p1374_p3  ;;  %p1172_p10 = por %p1171_p9, %p1170_p7 }
  0x40   : > { %p1168_p6 = pneg %p1167_p5 }
  0x42   : > { %p1173_p11 = pnand %p1172_p10, %p1168_p6 }
  0xb0   : > { %v618_v12 = vpop.f32.mrf.mxu1 }
  0xb1   : > { %v586_v13 = vpop.f32.mrf.mxu0  ;;  %v619_v14 = vadd.f32 %v1081_v10, %v618_v12 }
  0xb2   : > { %v587_v15 = vadd.f32 %v1082_v11, %v586_v13 }
  0xb3   : > { %977 = vmatpush.xpose.msk.msra.mxu3 %vm565_vm0, %v619_v14 }
  0xb4   : > { %v589_v16 = vmul.f32 0.17677669, %v587_v15 }
  0xb6   : > { %978 = vmatmul.msk.f32.vlgmr.msra.gmra.mxu3 %vm565_vm0, %v589_v16 }
  0xb8   : > { %v649_v30 = vpop.f32.mrf.mxu2 }
  0xb9   : > { %v650_v31 = vadd.f32 %v1083_v29, %v649_v30 }
  0xbb   : > { %979 = vmatpush.msk.msrb.mxu3 %vm698_vm2, %v650_v31 }
 0x139   : > { %v675_v20 = vpop.f32.mrf.mxu3 }
 0x13a   : > { %v679_v21 = vsel %vm678_vm1, %v675_v20, -inf }
 0x13b   : > { %680 = vmax.xlane.f32.xlu0 %v679_v21 }
 0x1ae   : > { %v681_v24 = vpop.xlane.xlu0 %680 }
 0x1af   : > { %v682_v25 = vsub.f32 %v675_v20, %v681_v24 }
 0x1b1   : > { %v683_v26 = vmul.f32 1.442695, %v682_v25 }
 0x1b3   : > { %1085 = vpow2.f32 %v683_v26 }
 0x1b9   : > { %v1086_v27 = vpop.eup %1085 }
 0x1ba   : > { %v685_v28 = vsel %vm678_vm1, %v1086_v27, 0.0 }
 0x1bb   : > { %686 = vadd.xlane.f32.xlu0 %v685_v28 }
 0x22e   : > { %v687_v36 = vpop.xlane.xlu0 %686 }
 0x22f   : > { %1087 = vrcp.f32 %v687_v36 }
 0x235   : > { %v1088_v37 = vpop.eup %1087 }
 0x236   : > { %v689_v38 = vmul.f32 %v1088_v37, %v687_v36 }
 0x238   : > { %v690_v39 = vsub.f32 2.0, %v689_v38 }
 0x23a   : > { %v691_v40 = vmul.f32 %v1088_v37, %v690_v39 }
 0x23c   : > { %v692_v41 = vmul.f32 %v1086_v27, %v691_v40 }
 0x23e   : > { %980 = vmatmul.msk.f32.vlgmr.msrb.gmra.mxu3 %vm694_vm3, %v692_v41  ;;  %693 = vst.msk [vmem:[%s521_s30] sm:$0xf] %vm678_vm1, %v692_v41 }
 0x2c1   : > { %v719_v42 = vpop.f32.mrf.mxu3 }
 0x2c2   : > { %981 = vmatmul.msk.f32.vlgmr.msrb.gmra.mxu0 %vm565_vm0, %v719_v42 }
 0x2c3   : > { %1176 = shalt.err (!%p1173_p11)
}
 0x2c4   : > { %995 = dma.vmem_to_hbm [thread:$0]  (%p1374_p3), %s782_s21, 64, %s784_s13, %s764_s14   ;;  %vm753_vm4 = vcmask 257024  }
 0x2c5   : > { %s1569_s29 = sld [smem:[#allocation18_spill]] }
 0x2c6   : > { %s1570_s24 = sld [smem:[#allocation19_spill]] }
 0x2cb   : > { %v1084_v43 = vld [vmem:[%s1569_s29] ss:$0 sm:$0xff] }
 0x2cc   : > { %s553_s25 = scalar_lea.vmem %s1570_s24, %s1425_s27 }
 0x33f   : > { %v750_v44 = vpop.f32.mrf.mxu0 }
 0x340   : > { %v751_v45 = vadd.f32 %v1084_v43, %v750_v44 }
 0x342   : > { %754 = vst.msk [vmem:[%s553_s25] sm:$0xf] %vm753_vm4, %v751_v45 }
 0x343 PF: > { %s1571_s26 = sld [smem:[#allocation14_spill]] }
 0x344   : > { %s1572_s18 = sld [smem:[#allocation11_spill]] }
 0x349   : > { %p1012_p12 = scmp.ge.s32.totalorder %s1571_s26, 2 }
 0x34a   : > { %s806_s17 = sand.u32 1, %s1572_s18  }
 0x34b   : > { %p1005_p3 = pnand %p1012_p12, %p1383_p8  ;;  %s807_s21 = scalar_lea.sflag [#allocation4], %s806_s17 }
 0x34d   : > { %p1006_p13 = pneg %p1005_p3 }
 0x34f   : > { %1218 = dma.done.wait (%p1006_p13), %s807_s21, 64  }
 0x350   : > { %1220 = vsyncadd (%p1006_p13), %s807_s21, 4294967232  ;;  %s28_s13 = sadd.s32 1, %s1571_s26   ;;  %s1574_s24 = sld [smem:[#allocation12_spill]] }
 0x351   : > { %p25_p0 = scmp.ge.s32.totalorder %s28_s13, 6   ;;  %s1575_s25 = sld [smem:[#allocation13_spill]] }
 0x352   : > { %s1576_s26 = sld [smem:[#allocation15_spill]]  ;;  %s1578_s21 = smov %s1227_s22 }
 0x353   : > { %s1577_s27 = sld [smem:[#allocation16_spill]]  ;;  %s1579_s22 = smov %s1231_s23 }
 0x354   : > { %s1580_s23 = smov %s1404_s28  ;;  %s1581_s28 = smov %s28_s13 }
 0x355   :  { %27 = sbr.rel (!%p25_p0) target bundleno = 11 (0xb), region = 126 }
 0x35a   :  { %813 = vsyncpa [#allocation3], 1 }
 0x35b   :  { %815 = vsyncpa [#allocation3 + $0x1], 1 }
 0x35c   :  { %816 = vsyncpa [#allocation6], 1 }
 0x35d   :  { %817 = vsyncpa [#allocation4], 1 }
 0x35e   :  { %819 = vsyncpa [#allocation4 + $0x1], 1 }

</bundles_post_ra>
